<compile_context>
chip_gen: v7x
topology: tpu7x:2x2x1
jax: 0.10.0
libtpu: 0.0.40
codegen_flags: <defaults>
</compile_context>

<pallas_src>
import math

import jax
import jax.numpy as jnp
from jax.experimental import pallas as pl
from jax.experimental.pallas import tpu as pltpu


def _round_up(x: int, m: int) -> int:
    return (x + m - 1) // m * m


def _eps_greedy_kernel(eps_ref, qs_ref, rand_act_ref, u_ref, act_ref):
    """One (A, TILE_N) tile: per-column argmax over actions + epsilon-greedy select."""
    qs = qs_ref[...].astype(jnp.float32)               # (A, TILE_N) f32 compute
    a = qs.shape[0]

    # Greedy = first index of the per-column max (torch.argmax tie-break).
    row = jax.lax.broadcasted_iota(jnp.int32, qs.shape, 0)
    maxv = jnp.max(qs, axis=0, keepdims=True)           # (1, TILE_N)
    # NaN guard: if a column's max is NaN, `qs == maxv` is false everywhere; treating
    # NaN entries as max candidates keeps the result in-range (first NaN index).
    is_cand = (qs == maxv) | jnp.isnan(qs)
    greedy = jnp.min(jnp.where(is_cand, row, jnp.int32(a)), axis=0, keepdims=True)

    eps = eps_ref[0]
    explore = u_ref[...] < eps                           # (1, TILE_N) bool
    act_ref[...] = jnp.where(explore, rand_act_ref[...], greedy)


def epsilon_greedy_select(agent_qs, t, key, *,
                          epsilon_start=1.0, epsilon_finish=0.05,
                          anneal_time=50000.0, decay="linear"):
    assert decay in ("linear", "exp")
    if decay != "linear":
        raise NotImplementedError  # matches the reference module
    delta = (epsilon_start - epsilon_finish) / anneal_time
    epsilon = max(epsilon_start - delta * float(t), epsilon_finish)

    lead = agent_qs.shape[:-1]
    num_actions = agent_qs.shape[-1]
    n = int(math.prod(lead)) if lead else 1

    # Lane-dense layout: (num_actions, N); keep the caller's dtype (bf16 OK).
    qs_t = jnp.asarray(agent_qs).reshape(n, num_actions).T

    # Tile N on 128-lane multiples; cap block size so the f32 working copy stays
    # well inside scoped-VMEM defaults on all generations.
    tile_n = min(4096, _round_up(n, 128))
    max_lanes = max(128, ((2 << 20) // (num_actions * 4)) // 128 * 128)
    tile_n = min(tile_n, max_lanes)
    n_pad = _round_up(n, tile_n)
    grid = n_pad // tile_n

    if n_pad != n:
        qs_t = jnp.pad(qs_t, ((0, 0), (0, n_pad - n)))

    # Exactly the randomness consumed: one action id + one uniform per batch element.
    # TODO(synk): torch's stateful global RNG has no Pallas equivalent; caller threads
    # an explicit jax.random key instead.
    k_act, k_u = jax.random.split(key)
    rand_actions = jax.random.randint(k_act, (1, n_pad), 0, num_actions, dtype=jnp.int32)
    uniforms = jax.random.uniform(k_u, (1, n_pad), dtype=jnp.float32)

    actions = pl.pallas_call(
        _eps_greedy_kernel,
        out_shape=jax.ShapeDtypeStruct((1, n_pad), jnp.int32),
        grid=(grid,),
        in_specs=[
            pl.BlockSpec(memory_space=pltpu.MemorySpace.SMEM),        # epsilon (1,)
            pl.BlockSpec((num_actions, tile_n), lambda i: (0, i)),    # q-values (A, N)
            pl.BlockSpec((1, tile_n), lambda i: (0, i)),              # random actions
            pl.BlockSpec((1, tile_n), lambda i: (0, i)),              # mask uniforms
        ],
        out_specs=pl.BlockSpec((1, tile_n), lambda i: (0, i)),
        compiler_params=pltpu.CompilerParams(dimension_semantics=("parallel",)),
    )(
        jnp.array([epsilon], jnp.float32),
        qs_t,
        rand_actions,
        uniforms,
    )

    return actions[0, :n].reshape(lead + (1,)), epsilon


if __name__ == "__main__":
    key = jax.random.PRNGKey(0)
    k_q, k_sel = jax.random.split(key)

    # Small shapes: batch=2, agents=4, num_actions=8 -> agent_qs (2, 4, 8)
    agent_qs = jax.random.normal(k_q, (2, 4, 8), dtype=jnp.float32)

    t = 12500.0  # expected epsilon = 1.0 - (0.95 / 50000) * 12500 = 0.7625
    actions, epsilon = epsilon_greedy_select(agent_qs, t, k_sel)
    actions = jax.block_until_ready(actions)

    assert actions.shape == (2, 4, 1)
    assert actions.dtype == jnp.int32
    assert bool(jnp.all(actions >= 0)) and bool(jnp.all(actions < 8))
    assert abs(epsilon - 0.7625) < 1e-9

    # epsilon == 0 path must reduce to plain argmax (pure greedy).
    greedy, eps0 = epsilon_greedy_select(agent_qs, 0.0, k_sel,
                                         epsilon_start=0.0, epsilon_finish=0.0)
    greedy = jax.block_until_ready(greedy)
    ref = jnp.argmax(agent_qs, axis=-1)[..., None].astype(jnp.int32)
    assert eps0 == 0.0
    assert bool(jnp.array_equal(greedy, ref))

    print("KERNEL_OK")
</pallas_src>

<mosaic_0001>
module attributes {stable_mosaic.version = 11 : i64} {
  func.func @_eps_greedy_kernel(%arg0: i32, %arg1: memref<1xf32, #tpu.memory_space<smem>>, %arg2: memref<8x128xf32, #tpu.memory_space<vmem>>, %arg3: memref<1x128xi32, #tpu.memory_space<vmem>>, %arg4: memref<1x128xf32, #tpu.memory_space<vmem>>, %arg5: memref<1x128xi32, #tpu.memory_space<vmem>>) attributes {dimension_semantics = [#tpu.dimension_semantics<parallel>], iteration_bounds = array<i64: 1>, scalar_prefetch = 0 : i64, scratch_operands = 0 : i64, tpu.core_type = #tpu.core_type<tc>, window_params = [{transform_indices = @transform_0, window_bounds = array<i64: 1>}, {transform_indices = @transform_1, window_bounds = array<i64: 8, 128>}, {transform_indices = @transform_2, window_bounds = array<i64: 1, 128>}, {transform_indices = @transform_3, window_bounds = array<i64: 1, 128>}, {transform_indices = @transform_4, window_bounds = array<i64: 1, 128>}]} {
    %c0 = arith.constant 0 : index
    %c0_0 = arith.constant 0 : index
    %0 = vector.load %arg2[%c0, %c0_0] : memref<8x128xf32, #tpu.memory_space<vmem>>, vector<8x128xf32>
    %1 = tpu.iota {dimensions = array<i32: 0>} : vector<8x128xi32>
    %cst = arith.constant dense<0xFF800000> : vector<128xf32>
    %2 = vector.multi_reduction <maximumf>, %0, %cst [0] : vector<8x128xf32> to vector<128xf32>
    %3 = vector.shape_cast %2 : vector<128xf32> to vector<1x128xf32>
    %4 = vector.broadcast %3 : vector<1x128xf32> to vector<8x128xf32>
    %5 = arith.cmpf oeq, %0, %4 : vector<8x128xf32>
    %6 = arith.cmpf one, %0, %0 : vector<8x128xf32>
    %7 = arith.ori %5, %6 : vector<8x128xi1>
    %c8_i32 = arith.constant 8 : i32
    %8 = vector.broadcast %c8_i32 : i32 to vector<8x128xi32>
    %9 = arith.select %7, %1, %8 : vector<8x128xi1>, vector<8x128xi32>
    %cst_1 = arith.constant dense<2147483647> : vector<128xi32>
    %10 = vector.multi_reduction <minsi>, %9, %cst_1 [0] : vector<8x128xi32> to vector<128xi32>
    %11 = vector.shape_cast %10 : vector<128xi32> to vector<1x128xi32>
    %c0_2 = arith.constant 0 : index
    %12 = memref.load %arg1[%c0_2] : memref<1xf32, #tpu.memory_space<smem>>
    %c0_3 = arith.constant 0 : index
    %c0_4 = arith.constant 0 : index
    %13 = vector.load %arg4[%c0_3, %c0_4] : memref<1x128xf32, #tpu.memory_space<vmem>>, vector<1x128xf32>
    %14 = vector.broadcast %12 : f32 to vector<1x128xf32>
    %15 = arith.cmpf olt, %13, %14 : vector<1x128xf32>
    %c0_5 = arith.constant 0 : index
    %c0_6 = arith.constant 0 : index
    %16 = vector.load %arg3[%c0_5, %c0_6] : memref<1x128xi32, #tpu.memory_space<vmem>>, vector<1x128xi32>
    %17 = arith.select %15, %16, %11 : vector<1x128xi1>, vector<1x128xi32>
    %c0_7 = arith.constant 0 : index
    %c0_8 = arith.constant 0 : index
    %18 = vector.load %arg5[%c0_7, %c0_8] : memref<1x128xi32, #tpu.memory_space<vmem>>, vector<1x128xi32>
    tpu.vector_store %arg5[%c0_7, %c0_8], %17 {strides = array<i32>} : memref<1x128xi32, #tpu.memory_space<vmem>>, vector<1x128xi32>,
    return
  }
  func.func @transform_0(%arg0: i32) -> i32 {
    %c0_i32 = arith.constant 0 : i32
    %c0_i32_0 = arith.constant 0 : i32
    return %c0_i32 : i32
  }
  func.func @transform_1(%arg0: i32) -> (i32, i32) {
    %c0_i32 = arith.constant 0 : i32
    %c0_i32_0 = arith.constant 0 : i32
    return %c0_i32, %arg0 : i32, i32
  }
  func.func @transform_2(%arg0: i32) -> (i32, i32) {
    %c0_i32 = arith.constant 0 : i32
    %c0_i32_0 = arith.constant 0 : i32
    return %c0_i32, %arg0 : i32, i32
  }
  func.func @transform_3(%arg0: i32) -> (i32, i32) {
    %c0_i32 = arith.constant 0 : i32
    %c0_i32_0 = arith.constant 0 : i32
    return %c0_i32, %arg0 : i32, i32
  }
  func.func @transform_4(%arg0: i32) -> (i32, i32) {
    %c0_i32 = arith.constant 0 : i32
    %c0_i32_0 = arith.constant 0 : i32
    return %c0_i32, %arg0 : i32, i32
  }
}

</mosaic_0001>

<bundles_post_ra>
// kernel: tpu_custom_call.1
= control target key start
LH: loop header
LB: loop body
LE: loop exit
PB: predicated region body
PF: predicated region fallthrough
CT: control target
= control target key end

     0   :  { %10 = vsyncpa [#allocation4], 0  ;;  %s185_s0 = inlined_call_operand.<no memory space> [shape: f32[1], index: 0, kind: input, shape index: {}]   ;;  %s186_s1 = inlined_call_operand.hbm [shape: f32[8,128], index: 1, kind: input, shape index: {}]   ;;  %s187_s2 = inlined_call_operand.vmem [shape: s32[1,128], index: 2, kind: input, shape index: {}]   ;;  %s188_s3 = inlined_call_operand.vmem [shape: f32[1,128], index: 3, kind: input, shape index: {}]   ;;  %s189_s4 = inlined_call_operand.hbm [shape: s32[1,128], index: 4, kind: output, shape index: {}]  }
   0x1   :  { %11 = vsyncpa [#allocation5], 0  ;;  %s125_s15 = smov [#allocation3]   ;;  %s77_s19 = scalar_lea.hbm %s186_s1, 128 }
   0x2   :  { %s20_s16 = sshll.u32 %s125_s15, 4  ;;  %p78_p0 = scmp.ne.s32.totalorder %s186_s1, %s77_s19  ;;  %s21_s16 = int_to_ptr.vmem [resolvable:$true] %s20_s16 }
   0x3   :  { %p81_p1 = scmp.lt.u32.totalorder %s77_s19, %s186_s1 }
   0x5   :  { %p83_p2 = pnand %p81_p1, %p78_p0 }
   0x7   :  { %86 = shalt.err (!%p83_p2)
}
   0x8   :  { %s87_s24 = scalar_lea.vmem %s21_s16, 128  ;;  %p92_p4 = scmp.lt.s32.totalorder %s21_s16, %s21_s16 }
   0x9   :  { %p88_p3 = scmp.ne.s32.totalorder %s21_s16, %s87_s24  ;;  %p93_p5 = scmp.lt.s32.totalorder %s87_s24, %s87_s24 }
   0xb   :  { %p94_p6 = por %p93_p5, %p92_p4 }
   0xd   :  { %p95_p7 = pnand %p94_p6, %p88_p3 }
   0xf   :  { %98 = shalt.err (!%p95_p7)
}
  0x10   :  { %23 = dma.hbm_to_vmem [thread:$0]  %s186_s1, 128, %s21_s16, [#allocation4]  }
  0x11   :  { %121 = dma.done.wait [#allocation4], 128  }
  0x12   :  { %122 = vsyncadd [#allocation4], 4294967168  ;;  %v31_v0 = vld [vmem:[#allocation3] sm:$0xff]  ;;  %v32_v4 = vlaneseq  ;;  %v55_v14 = vstv %s185_s0  ;;  %s126_s30 = smov [#allocation6]  }
  0x13   :  { %v34_v1 = vrot.slane %v31_v0, 4  ;;  %vm41_vm0 = vcmp.ne.f32.partialorder %v31_v0, %v31_v0  ;;  %v54_v13 = vld [vmem:[%s188_s3] sm:$0x1]  ;;  %s66_s5 = sshll.u32 %s126_s30, 4  ;;  %s67_s5 = int_to_ptr.vmem [resolvable:$true] %s66_s5 }
  0x14   :  { %v33_v7 = vshrl.u32 %v32_v4, 7  ;;  %vm56_vm5 = vcmp.lt.f32.partialorder %v54_v13, %v55_v14  ;;  %v57_v17 = vld [vmem:[%s187_s2] sm:$0x1]  ;;  %s99_s8 = scalar_lea.vmem %s67_s5, 16  ;;  %s103_s3 = scalar_lea.vmem %s67_s5, 32 }
  0x15   :  { %v35_v2 = vmax.f32 %v31_v0, %v34_v1  ;;  %p100_p8 = scmp.ne.s32.totalorder %s67_s5, %s99_s8  ;;  %p104_p9 = scmp.lt.s32.totalorder %s67_s5, %s67_s5 }
  0x16   :  { %p105_p10 = scmp.lt.s32.totalorder %s103_s3, %s99_s8 }
  0x17   :  { %v36_v3 = vrot.slane %v35_v2, 2 }
  0x18   :  { %p106_p11 = por %p105_p10, %p104_p9 }
  0x19   :  { %v37_v5 = vmax.f32 %v35_v2, %v36_v3 }
  0x1a   :  { %p107_p12 = pnand %p106_p11, %p100_p8 }
  0x1b   :  { %v38_v6 = vrot.slane %v37_v5, 1 }
  0x1d   :  { %v39_v8 = vmax.f32 %v37_v5, %v38_v6 }
  0x1f   :  { %vm40_vm1 = vcmp.eq.f32.partialorder %v31_v0, %v39_v8 }
  0x20   :  { %vm42_vm2 = vmor %vm40_vm1, %vm41_vm0 }
  0x21   :  { %v43_v9 = vsel %vm42_vm2, %v33_v7, 8 }
  0x22   :  { %v44_v10 = vrot.slane %v43_v9, 4 }
  0x24   :  { %vm45_vm3 = vcmp.lt.s32.totalorder %v43_v9, %v44_v10 }
  0x25   :  { %v46_v11 = vsel %vm45_vm3, %v43_v9, %v44_v10 }
  0x26   :  { %v47_v12 = vrot.slane %v46_v11, 2 }
  0x28   :  { %vm48_vm4 = vcmp.lt.s32.totalorder %v46_v11, %v47_v12 }
  0x29   :  { %v49_v15 = vsel %vm48_vm4, %v46_v11, %v47_v12 }
  0x2a   :  { %v50_v16 = vrot.slane %v49_v15, 1 }
  0x2c   :  { %vm51_vm6 = vcmp.lt.s32.totalorder %v49_v15, %v50_v16 }
  0x2d   :  { %v52_v18 = vsel %vm51_vm6, %v49_v15, %v50_v16 }
  0x2e   :  { %v58_v19 = vsel %vm56_vm5, %v57_v17, %v52_v18 }
  0x2f   :  { %59 = vst [vmem:[#allocation6] sm:$0x1] %v58_v19 }
  0x30   :  { %110 = shalt.err (!%p107_p12)
}
  0x31   :  { %s111_s10 = scalar_lea.hbm %s189_s4, 16 }
  0x32   :  { %p112_p13 = scmp.ne.s32.totalorder %s189_s4, %s111_s10  ;;  %p115_p0 = scmp.lt.u32.totalorder %s111_s10, %s189_s4 }
  0x34   :  { %p117_p1 = pnand %p115_p0, %p112_p13 }
  0x36   :  { %120 = shalt.err (!%p117_p1)
}
  0x37   :  { %69 = dma.vmem_to_hbm [thread:$0]  %s67_s5, 16, %s189_s4, [#allocation5]  }
  0x38   :  { %123 = dma.done.wait [#allocation5], 16  }
  0x39   :  { %124 = vsyncadd [#allocation5], 4294967280 }
  0x3a   :  { %73 = vsyncpa [#allocation4], 1 }
  0x3b   :  { %74 = vsyncpa [#allocation5], 1 }

</bundles_post_ra>
